<compile_context>
chip_gen: v5e
topology: v5e:2x2
jax: 0.10.0
libtpu: 0.0.40
codegen_flags: <defaults>
</compile_context>

<pallas_src>
import functools
import math

import jax
import jax.numpy as jnp
from jax.experimental import pallas as pl
from jax.experimental.pallas import tpu as pltpu


# 48 MiB: comfortably inside v7x's 64 MiB/TC, non-binding on v5e/v6e (128 MiB).
_VMEM_LIMIT = 48 * 1024 * 1024


def _pick_tile(dim, targets):
    """Largest target tile that evenly divides dim; else the full dim."""
    for t in targets:
        if dim % t == 0:
            return t
    return dim


def _pick_m_tile(M, targets=(512, 256, 128)):
    """Row tile that yields >=2 grid steps when possible (v7x megacore)."""
    for t in targets:
        if M % t == 0 and M // t >= 2:
            return t
    if M % 16 == 0 and M >= 32:
        return M // 2
    return M


def _to_bf16(x):
    return x if x.dtype == jnp.bfloat16 else x.astype(jnp.bfloat16)


# ----------------------------- Pallas kernels -----------------------------

def _dense_kernel(x_ref, w_ref, b_ref, o_ref, *, activation):
    """Weight-resident o = act(x @ w + b); full K and N per step, M tiled."""
    y = jnp.dot(x_ref[...], w_ref[...], preferred_element_type=jnp.float32)
    y = y + b_ref[...]
    if activation == "gelu":            # exact (erf) GELU, as in HF BERT
        y = 0.5 * y * (1.0 + jax.lax.erf(y * 0.7071067811865476))
    elif activation == "tanh":
        y = jnp.tanh(y)
    o_ref[...] = y.astype(o_ref.dtype)


def dense(x, w, b, activation="none"):
    """bf16 GEMM with f32 MXU accumulation. x:[M,K], w:[K,N] -> bf16 [M,N].

    The full (K, N) bf16 weight block sits in VMEM (constant block index, so
    it is only DMA'd once); only M is tiled.  For layers much larger than
    BERT-large a K/N-tiled variant would be required.
    """
    M, K = x.shape
    K2, N = w.shape
    assert K == K2
    tm = _pick_m_tile(M)
    b2 = b.reshape(1, N).astype(jnp.float32)
    return pl.pallas_call(
        functools.partial(_dense_kernel, activation=activation),
        out_shape=jax.ShapeDtypeStruct((M, N), jnp.bfloat16),
        grid=(M // tm,),
        in_specs=[
            pl.BlockSpec((tm, K), lambda i: (i, 0)),
            pl.BlockSpec((K, N), lambda i: (0, 0)),    # weight-resident block
            pl.BlockSpec((1, N), lambda i: (0, 0)),
        ],
        out_specs=pl.BlockSpec((tm, N), lambda i: (i, 0)),
        compiler_params=pltpu.CompilerParams(
            dimension_semantics=("parallel",),
            vmem_limit_bytes=_VMEM_LIMIT,
        ),
    )(_to_bf16(x), _to_bf16(w), b2)


def _dense_res_ln_kernel(x_ref, w_ref, b_ref, r_ref, g_ref, bt_ref, o_ref,
                         *, eps):
    """o = LayerNorm(x @ w + b + residual) * g + beta; weight-resident."""
    y = jnp.dot(x_ref[...], w_ref[...], preferred_element_type=jnp.float32)
    y = y + b_ref[...] + r_ref[...].astype(jnp.float32)
    mean = jnp.mean(y, axis=-1, keepdims=True)
    var = jnp.mean(jnp.square(y - mean), axis=-1, keepdims=True)
    inv = jax.lax.rsqrt(var + eps)
    o_ref[...] = ((y - mean) * inv * g_ref[...] + bt_ref[...]
                  ).astype(o_ref.dtype)


def dense_residual_layernorm(x, w, b, residual, gamma, beta, eps=1e-12):
    """Fused projection + bias + residual-add + LayerNorm epilogue."""
    M, K = x.shape
    K2, N = w.shape
    assert K == K2
    tm = _pick_m_tile(M)
    b2 = b.reshape(1, N).astype(jnp.float32)
    g2 = gamma.reshape(1, N).astype(jnp.float32)
    bt2 = beta.reshape(1, N).astype(jnp.float32)
    return pl.pallas_call(
        functools.partial(_dense_res_ln_kernel, eps=eps),
        out_shape=jax.ShapeDtypeStruct((M, N), jnp.bfloat16),
        grid=(M // tm,),
        in_specs=[
            pl.BlockSpec((tm, K), lambda i: (i, 0)),
            pl.BlockSpec((K, N), lambda i: (0, 0)),    # weight-resident block
            pl.BlockSpec((1, N), lambda i: (0, 0)),
            pl.BlockSpec((tm, N), lambda i: (i, 0)),
            pl.BlockSpec((1, N), lambda i: (0, 0)),
            pl.BlockSpec((1, N), lambda i: (0, 0)),
        ],
        out_specs=pl.BlockSpec((tm, N), lambda i: (i, 0)),
        compiler_params=pltpu.CompilerParams(
            dimension_semantics=("parallel",),
            vmem_limit_bytes=_VMEM_LIMIT,
        ),
    )(_to_bf16(x), _to_bf16(w), b2, _to_bf16(residual), g2, bt2)


def _ln_kernel(x_ref, g_ref, b_ref, o_ref, *, eps):
    x = x_ref[...].astype(jnp.float32)
    mean = jnp.mean(x, axis=-1, keepdims=True)
    var = jnp.mean(jnp.square(x - mean), axis=-1, keepdims=True)
    inv = jax.lax.rsqrt(var + eps)
    o_ref[...] = ((x - mean) * inv * g_ref[...] + b_ref[...]).astype(o_ref.dtype)


def layernorm(x, gamma, beta, eps=1e-12):
    """Standalone LayerNorm (embeddings) — no zero residual materialized."""
    M, H = x.shape
    tm = _pick_m_tile(M)
    g2 = gamma.reshape(1, H).astype(jnp.float32)
    b2 = beta.reshape(1, H).astype(jnp.float32)
    return pl.pallas_call(
        functools.partial(_ln_kernel, eps=eps),
        out_shape=jax.ShapeDtypeStruct((M, H), jnp.bfloat16),
        grid=(M // tm,),
        in_specs=[
            pl.BlockSpec((tm, H), lambda i: (i, 0)),
            pl.BlockSpec((1, H), lambda i: (0, 0)),
            pl.BlockSpec((1, H), lambda i: (0, 0)),
        ],
        out_specs=pl.BlockSpec((tm, H), lambda i: (i, 0)),
        compiler_params=pltpu.CompilerParams(
            dimension_semantics=("parallel",)),
    )(x.astype(jnp.float32), g2, b2)


def _flash_attn_kernel(q_ref, k_ref, v_ref, mask_ref, o_ref,
                       m_sc, l_sc, acc_sc, *, hpg, dh):
    """Flash attention for `hpg` heads of one (batch, q_tile); the kv-tile
    grid axis is the online-softmax reduction.  Q/K/V blocks are column views
    of the fused [B*S, 3H] activation; 1/sqrt(dh) is already folded into the
    Q projection weights, so no scale multiply here."""
    kv = pl.program_id(3)

    @pl.when(kv == 0)
    def _():
        m_sc[...] = jnp.full_like(m_sc, -jnp.inf)
        l_sc[...] = jnp.zeros_like(l_sc)
        acc_sc[...] = jnp.zeros_like(acc_sc)

    mask = mask_ref[0]                              # f32 [1, tk] additive bias

    for h in range(hpg):                            # static unroll over heads
        cols = slice(h * dh, (h + 1) * dh)
        q = q_ref[:, cols]                          # bf16 [tq, dh]
        k = k_ref[:, cols]                          # bf16 [tk, dh]
        v = v_ref[:, cols]                          # bf16 [tk, dh]

        s = jax.lax.dot_general(q, k, (((1,), (1,)), ((), ())),
                                preferred_element_type=jnp.float32)  # [tq, tk]
        s = s + mask

        m_prev = m_sc[:, h:h + 1]
        l_prev = l_sc[:, h:h + 1]
        m_new = jnp.maximum(m_prev, jnp.max(s, axis=-1, keepdims=True))
        alpha = jnp.exp(m_prev - m_new)
        p = jnp.exp(s - m_new)
        l_sc[:, h:h + 1] = alpha * l_prev + jnp.sum(p, axis=-1, keepdims=True)
        acc_sc[:, cols] = alpha * acc_sc[:, cols] + jnp.dot(
            p.astype(v.dtype), v, preferred_element_type=jnp.float32)
        m_sc[:, h:h + 1] = m_new

    @pl.when(kv == pl.num_programs(3) - 1)
    def _():
        parts = []
        for h in range(hpg):
            inv = pl.reciprocal(l_sc[:, h:h + 1], approx=True)
            parts.append(acc_sc[:, h * dh:(h + 1) * dh] * inv)
        # Single lane-dense store of the whole head group.
        o_ref[...] = jnp.concatenate(parts, axis=-1).astype(o_ref.dtype)


def attention(qkv, mask_bias, B, S, nh, dh):
    """Flash attention straight from the fused QKV activation.

    qkv:       [B*S, 3H] bf16, columns [Q | K | V], each head-major.
    mask_bias: [B, 1, S]  f32 additive mask (0 / -10000).
    returns    [B*S, H]   bf16 merged-head context (no XLA transposes).
    """
    H = nh * dh
    assert qkv.shape == (B * S, 3 * H)
    # Pack heads per grid step until the block is 128 lanes wide.
    hpg = max(1, 128 // dh)
    while nh % hpg:
        hpg -= 1
    W = hpg * dh                     # lane width of one head group
    ng = nh // hpg                   # number of head groups
    tq = _pick_tile(S, (512, 256, 128))
    tk = _pick_tile(S, (512, 256, 128))
    q_rows, k_rows = S // tq, S // tk

    return pl.pallas_call(
        functools.partial(_flash_attn_kernel, hpg=hpg, dh=dh),
        out_shape=jax.ShapeDtypeStruct((B * S, H), jnp.bfloat16),
        grid=(B, ng, S // tq, S // tk),
        in_specs=[
            # Q / K / V are three column views of the same fused activation.
            pl.BlockSpec((tq, W),
                         lambda b, hg, qi, ki: (b * q_rows + qi, hg)),
            pl.BlockSpec((tk, W),
                         lambda b, hg, qi, ki: (b * k_rows + ki, ng + hg)),
            pl.BlockSpec((tk, W),
                         lambda b, hg, qi, ki: (b * k_rows + ki, 2 * ng + hg)),
            pl.BlockSpec((1, 1, tk), lambda b, hg, qi, ki: (b, 0, ki)),
        ],
        out_specs=pl.BlockSpec((tq, W),
                               lambda b, hg, qi, ki: (b * q_rows + qi, hg)),
        scratch_shapes=[
            pltpu.VMEM((tq, hpg), jnp.float32),   # running max (per head)
            pltpu.VMEM((tq, hpg), jnp.float32),   # running sum (per head)
            pltpu.VMEM((tq, W), jnp.float32),     # output accumulator
        ],
        compiler_params=pltpu.CompilerParams(
            dimension_semantics=("parallel", "parallel", "parallel",
                                 "arbitrary"),
            vmem_limit_bytes=_VMEM_LIMIT,
        ),
    )(qkv, qkv, qkv, mask_bias.astype(jnp.float32))


# ----------------------------- parameters ---------------------------------

def init_params(key, cfg):
    H, I = cfg["hidden"], cfg["intermediate"]
    dh = H // cfg["heads"]
    scale = 1.0 / math.sqrt(dh)
    keys = iter(jax.random.split(key, 64))

    def nrm(shape):
        return jax.random.normal(next(keys), shape, jnp.float32) * 0.02

    params = {
        "word_emb": nrm((cfg["vocab"], H)),
        "pos_emb": nrm((cfg["max_pos"], H)),
        "type_emb": nrm((cfg["type_vocab"], H)),
        "emb_ln_g": jnp.ones((H,), jnp.float32),
        "emb_ln_b": jnp.zeros((H,), jnp.float32),
        "layers": [],
        "pool_w": nrm((H, H)),
        "pool_b": jnp.zeros((H,), jnp.float32),
        "fc_w": nrm((H, cfg["num_classes"])),
        "fc_b": jnp.zeros((cfg["num_classes"],), jnp.float32),
    }
    for _ in range(cfg["layers"]):
        # Fused Q/K/V projection, columns [0:H]=Q, [H:2H]=K, [2H:3H]=V.
        # The 1/sqrt(dh) attention scale is folded into the Q columns here so
        # the flash-attention kernel never multiplies by it.
        qkv_w = nrm((H, 3 * H))
        qkv_w = qkv_w.at[:, :H].multiply(scale)
        qkv_b = jnp.zeros((3 * H,), jnp.float32)
        qkv_b = qkv_b.at[:H].multiply(scale)
        params["layers"].append({
            # GEMM weights pre-cast to bf16 once (no per-forward convert).
            "qkv_w": qkv_w.astype(jnp.bfloat16),
            "qkv_b": qkv_b,
            "ao_w": nrm((H, H)).astype(jnp.bfloat16),
            "ao_b": jnp.zeros((H,), jnp.float32),
            "attn_ln_g": jnp.ones((H,), jnp.float32),
            "attn_ln_b": jnp.zeros((H,), jnp.float32),
            "fi_w": nrm((H, I)).astype(jnp.bfloat16),
            "fi_b": jnp.zeros((I,), jnp.float32),
            "fo_w": nrm((I, H)).astype(jnp.bfloat16),
            "fo_b": jnp.zeros((H,), jnp.float32),
            "ffn_ln_g": jnp.ones((H,), jnp.float32),
            "ffn_ln_b": jnp.zeros((H,), jnp.float32),
        })
    return params


# ----------------------------- forward pass --------------------------------

def bert_classifier(params, input_ids, attention_mask, token_type_ids, cfg):
    B, S = input_ids.shape
    H, nh = cfg["hidden"], cfg["heads"]
    dh = H // nh

    # TODO(synk): embedding table gathers + dropout (identity in eval) stay in JAX.
    emb = (params["word_emb"][input_ids]
           + params["pos_emb"][jnp.arange(S)][None, :, :]
           + params["type_emb"][token_type_ids])
    x = layernorm(emb.reshape(B * S, H), params["emb_ln_g"], params["emb_ln_b"])

    # Additive attention mask bias, HF convention: (1 - mask) * -10000.
    mask_bias = ((1.0 - attention_mask.astype(jnp.float32)) * -10000.0
                 ).reshape(B, 1, S)

    for lp in params["layers"]:
        # Fused QKV projection: one weight-resident MXU pass with N = 3H.
        qkv = dense(x, lp["qkv_w"], lp["qkv_b"])            # [B*S, 3H] bf16

        # Flash attention reads Q/K/V column views of `qkv` directly and
        # writes the merged-head context in [B*S, H] — no XLA head transposes.
        ctx = attention(qkv, mask_bias, B, S, nh, dh)       # [B*S, H] bf16

        # Attention output projection fused with bias + residual + LayerNorm.
        x = dense_residual_layernorm(ctx, lp["ao_w"], lp["ao_b"], x,
                                     lp["attn_ln_g"], lp["attn_ln_b"])

        # FFN: intermediate GEMM with GELU epilogue, then output GEMM fused
        # with bias + residual + LayerNorm.
        ffn = dense(x, lp["fi_w"], lp["fi_b"], activation="gelu")
        x = dense_residual_layernorm(ffn, lp["fo_w"], lp["fo_b"], x,
                                     lp["ffn_ln_g"], lp["ffn_ln_b"])

    hidden = x.reshape(B, S, H)
    cls = hidden[:, 0, :].astype(jnp.float32)               # [CLS] token
    # TODO(synk): tiny [B,H]x[H,*] pooler / classifier GEMMs stay in plain JAX
    # (Pallas launch overhead and masked lanes dominate at these shapes).
    pooled = jnp.tanh(cls @ params["pool_w"] + params["pool_b"])
    logits = pooled @ params["fc_w"] + params["fc_b"]
    return logits


# --------------------------------- main ------------------------------------

if __name__ == "__main__":
    cfg = dict(vocab=128, hidden=128, heads=2, layers=2, intermediate=512,
               max_pos=32, type_vocab=2, num_classes=3)

    key = jax.random.PRNGKey(0)
    pkey, dkey = jax.random.split(key)
    params = init_params(pkey, cfg)

    B, S = 2, 16
    input_ids = jax.random.randint(dkey, (B, S), 0, cfg["vocab"], dtype=jnp.int32)
    attention_mask = jnp.concatenate(
        [jnp.ones((B, S - 4), jnp.int32),
         jnp.array([[1, 1, 1, 1], [0, 0, 0, 0]], jnp.int32)], axis=1)
    token_type_ids = jnp.zeros((B, S), dtype=jnp.int32)

    logits = bert_classifier(params, input_ids, attention_mask,
                             token_type_ids, cfg)
    jax.block_until_ready(logits)
    assert logits.shape == (B, cfg["num_classes"])
    assert bool(jnp.all(jnp.isfinite(logits)))
    print("KERNEL_OK")
</pallas_src>

<mosaic_0001>
module attributes {stable_mosaic.version = 11 : i64} {
  func.func @_ln_kernel(%arg0: i32, %arg1: memref<16x128xf32, #tpu.memory_space<vmem>>, %arg2: memref<1x128xf32, #tpu.memory_space<vmem>>, %arg3: memref<1x128xf32, #tpu.memory_space<vmem>>, %arg4: memref<16x128xbf16, #tpu.memory_space<vmem>>) attributes {dimension_semantics = [#tpu.dimension_semantics<parallel>], iteration_bounds = array<i64: 2>, scalar_prefetch = 0 : i64, scratch_operands = 0 : i64, tpu.core_type = #tpu.core_type<tc>, window_params = [{transform_indices = @transform_0, window_bounds = array<i64: 16, 128>}, {pipeline_mode = #tpu.pipeline_mode<synchronous>, transform_indices = @transform_1, window_bounds = array<i64: 1, 128>}, {pipeline_mode = #tpu.pipeline_mode<synchronous>, transform_indices = @transform_2, window_bounds = array<i64: 1, 128>}, {transform_indices = @transform_3, window_bounds = array<i64: 16, 128>}]} {
    %c0 = arith.constant 0 : index
    %c0_0 = arith.constant 0 : index
    %0 = vector.load %arg1[%c0, %c0_0] : memref<16x128xf32, #tpu.memory_space<vmem>>, vector<16x128xf32>
    %cst = arith.constant dense<0.000000e+00> : vector<16xf32>
    %1 = vector.multi_reduction <add>, %0, %cst [1] : vector<16x128xf32> to vector<16xf32>
    %2 = vector.shape_cast %1 : vector<16xf32> to vector<16x1xf32>
    %cst_1 = arith.constant 1.280000e+02 : f32
    %3 = vector.broadcast %cst_1 : f32 to vector<16x1xf32>
    %4 = arith.divf %2, %3 : vector<16x1xf32>
    %5 = vector.broadcast %4 : vector<16x1xf32> to vector<16x128xf32>
    %6 = arith.subf %0, %5 : vector<16x128xf32>
    %7 = arith.mulf %6, %6 : vector<16x128xf32>
    %cst_2 = arith.constant dense<0.000000e+00> : vector<16xf32>
    %8 = vector.multi_reduction <add>, %7, %cst_2 [1] : vector<16x128xf32> to vector<16xf32>
    %9 = vector.shape_cast %8 : vector<16xf32> to vector<16x1xf32>
    %cst_3 = arith.constant 1.280000e+02 : f32
    %10 = vector.broadcast %cst_3 : f32 to vector<16x1xf32>
    %11 = arith.divf %9, %10 : vector<16x1xf32>
    %cst_4 = arith.constant 9.99999996E-13 : f32
    %12 = vector.broadcast %cst_4 : f32 to vector<16x1xf32>
    %13 = arith.addf %11, %12 : vector<16x1xf32>
    %14 = math.rsqrt %13 : vector<16x1xf32>
    %15 = vector.broadcast %4 : vector<16x1xf32> to vector<16x128xf32>
    %16 = arith.subf %0, %15 : vector<16x128xf32>
    %17 = vector.broadcast %14 : vector<16x1xf32> to vector<16x128xf32>
    %18 = arith.mulf %16, %17 : vector<16x128xf32>
    %c0_5 = arith.constant 0 : index
    %c0_6 = arith.constant 0 : index
    %19 = vector.load %arg2[%c0_5, %c0_6] : memref<1x128xf32, #tpu.memory_space<vmem>>, vector<1x128xf32>
    %20 = vector.broadcast %19 : vector<1x128xf32> to vector<16x128xf32>
    %21 = arith.mulf %18, %20 : vector<16x128xf32>
    %c0_7 = arith.constant 0 : index
    %c0_8 = arith.constant 0 : index
    %22 = vector.load %arg3[%c0_7, %c0_8] : memref<1x128xf32, #tpu.memory_space<vmem>>, vector<1x128xf32>
    %23 = vector.broadcast %22 : vector<1x128xf32> to vector<16x128xf32>
    %24 = arith.addf %21, %23 : vector<16x128xf32>
    %25 = arith.truncf %24 : vector<16x128xf32> to vector<16x128xbf16>
    %c0_9 = arith.constant 0 : index
    %c0_10 = arith.constant 0 : index
    %26 = vector.load %arg4[%c0_9, %c0_10] : memref<16x128xbf16, #tpu.memory_space<vmem>>, vector<16x128xbf16>
    tpu.vector_store %arg4[%c0_9, %c0_10], %25 {strides = array<i32>} : memref<16x128xbf16, #tpu.memory_space<vmem>>, vector<16x128xbf16>,
    return
  }
  func.func @transform_0(%arg0: i32) -> (i32, i32) {
    %c0_i32 = arith.constant 0 : i32
    %c0_i32_0 = arith.constant 0 : i32
    return %arg0, %c0_i32 : i32, i32
  }
  func.func @transform_1(%arg0: i32) -> (i32, i32) {
    %c0_i32 = arith.constant 0 : i32
    %c0_i32_0 = arith.constant 0 : i32
    %c0_i32_1 = arith.constant 0 : i32
    return %c0_i32, %c0_i32_0 : i32, i32
  }
  func.func @transform_2(%arg0: i32) -> (i32, i32) {
    %c0_i32 = arith.constant 0 : i32
    %c0_i32_0 = arith.constant 0 : i32
    %c0_i32_1 = arith.constant 0 : i32
    return %c0_i32, %c0_i32_0 : i32, i32
  }
  func.func @transform_3(%arg0: i32) -> (i32, i32) {
    %c0_i32 = arith.constant 0 : i32
    %c0_i32_0 = arith.constant 0 : i32
    return %arg0, %c0_i32 : i32, i32
  }
}

</mosaic_0001>

<bundles_post_ra>
// kernel: tpu_custom_call.1
= control target key start
LH: loop header
LB: loop body
LE: loop exit
PB: predicated region body
PF: predicated region fallthrough
CT: control target
= control target key end

     0   :  { %8 = vsyncpa [#allocation3], 0  ;;  %s769_s0 = inlined_call_operand.hbm [shape: f32[32,128], index: 0, kind: input, shape index: {}]   ;;  %s770_s1 = inlined_call_operand.hbm [shape: f32[1,128], index: 1, kind: input, shape index: {}]   ;;  %s771_s2 = inlined_call_operand.vmem [shape: f32[1,128], index: 2, kind: input, shape index: {}]   ;;  %s772_s3 = inlined_call_operand.hbm [shape: bf16[32,128], index: 3, kind: output, shape index: {}]  }
   0x1   :  { %10 = vsyncpa [#allocation3 + $0x1], 0 }
   0x2   :  { %11 = vsyncpa [#allocation6], 0 }
   0x3   :  { %12 = vsyncpa [#allocation4], 0 }
   0x4   :  { %14 = vsyncpa [#allocation4 + $0x1], 0  ;;  %s623_s12 = smov 0   ;;  %s625_s13 = smov 0  }
   0x5   :  { %s627_s14 = smov 0   ;;  %s629_s15 = smov 0  }
   0x6 LB: > { %s644_s16 = sadd.s32 4294967295, %s595_s15   ;;  %s372_s17 = sadd.s32 4294967294, %s595_s15   ;;  %s595_s15 = sphi %s629_s15, %s783_s15   ;;  %s591_s14 = sphi %s627_s14, %s782_s14   ;;  %s587_s13 = sphi %s625_s13, %s781_s13   ;;  %s583_s12 = sphi %s623_s12, %s780_s12  }
   0x7   : > { %s648_s18 = sadd.s32 1, %s595_s15   ;;  %s27_s19 = sadd.s32 1, %s591_s14 }
   0x8   : > { %s24_s20 = ssub.s32 %s595_s15, %s648_s18  ;;  %p34_p0 = scmp.ne.s32.totalorder %s591_s14, %s587_s13 }
   0x9   : > { %p25_p1 = scmp.eq.s32.totalorder %s24_s20, 0  ;;  %p35_p2 = scmp.eq.s32.totalorder %s595_s15, 0 }
   0xa   : > { %p40_p3 = scmp.ne.s32.totalorder %s587_s13, %s583_s12  ;;  %p41_p4 = scmp.eq.s32.totalorder %s644_s16, 0 }
   0xb   : > { %s660_s21 = scalar_select %p25_p1, %s591_s14, %s27_s19  }
   0xc   : > { %p662_p5 = por %p35_p2, %p34_p0  ;;  %p668_p6 = por %p41_p4, %p40_p3 }
   0xd   : > { %p106_p7 = scmp.eq.s32.totalorder %s644_s16, 1  ;;  %p112_p8 = scmp.eq.s32.totalorder %s372_s17, 1 }
   0xe   : > { %p373_p9 = scmp.ge.s32.totalorder %s595_s15, 1  ;;  %p119_p10 = scmp.lt.s32.totalorder %s595_s15, 3 }
   0xf   : > { %p675_p11 = por %p106_p7, %p34_p0  ;;  %p679_p12 = por %p112_p8, %p40_p3 }
  0x10   : > { %p683_p13 = pnand %p373_p9, %p119_p10  ;;  %s131_s29 = sshll.u32 %s770_s1, 4  ;;  %s132_s29 = int_to_ptr.hbm [resolvable:$true] %s131_s29 }
  0x11   : > { %s597_s30 = smov [#allocation5]   ;;  %p416_p3 = scmp.lt.s32.totalorder %s595_s15, 2 }
  0x12   : > { %p403_p1 = pneg %p683_p13  ;;  %s133_s4 = sshll.u32 %s597_s30, 4  ;;  %s134_s4 = int_to_ptr.vmem [resolvable:$true] %s133_s4 }
  0x13   : > { %s147_s5 = sand.u32 1, %s591_s14   ;;  %p699_p7 = pnand %p416_p3, %p662_p5 }
  0x14   : > { %p404_p2 = pnand %p403_p1, %p41_p4  ;;  %s376_s7 = sshll.u32 %s147_s5, 4 }
  0x15   : > { %s388_s8 = sshll.u32 %s595_s15, 4  ;;  %s151_s19 = scalar_lea.vmem [#allocation2], %s376_s7 }
  0x16   : > { %406 = dma.hbm_to_vmem [thread:$0]  (!%p404_p2), %s132_s29, 16, %s134_s4, [#allocation6]  }
  0x17   : > { %s156_s11 = scalar_lea.hbm %s769_s0, %s388_s8  ;;  %s159_s20 = sshll.u32 %s151_s19, 4  ;;  %s160_s20 = int_to_ptr.vmem [resolvable:$true] %s159_s20 }
  0x18   : > { %s157_s17 = sshll.u32 %s156_s11, 4  ;;  %s148_s27 = scalar_lea.sflag [#allocation3], %s147_s5  ;;  %s158_s17 = int_to_ptr.hbm [resolvable:$true] %s157_s17 }
  0x19   : > { %s495_s28 = sshra.s32 %s158_s17, 4  ;;  %p499_p8 = pneg %p699_p7  ;;  %s496_s28 = int_to_ptr.hbm [resolvable:$true] %s495_s28 }
  0x1a   : > { %s497_s22 = scalar_lea.hbm %s496_s28, 16  ;;  %s502_s4 = scalar_lea.hbm %s769_s0, 32 }
  0x1b   : > { %p498_p5 = scmp.ne.s32.totalorder %s496_s28, %s497_s22  ;;  %p503_p1 = scmp.lt.s32.totalorder %s496_s28, %s769_s0 }
  0x1c   : > { %p504_p2 = scmp.lt.s32.totalorder %s502_s4, %s497_s22 }
  0x1d   : > { %p500_p9 = pnand %p499_p8, %p498_p5 }
  0x1e   : > { %p505_p3 = por %p504_p2, %p503_p1 }
  0x1f   : > { %p501_p10 = pneg %p500_p9 }
  0x21   : > { %p506_p0 = pnand %p505_p3, %p501_p10 }
  0x23   : > { %509 = shalt.err (!%p506_p0)
}
  0x24   : > { %s598_s5 = smov 128   ;;  %s599_s7 = smov 8  }
  0x25   : > { %410 = dma.hbm_to_vmem [thread:$0]  (!%p699_p7), %s158_s17, 256, %s160_s20, %s148_s27, %s598_s5, %s598_s5, %s599_s7  }
  0x26   : > { %171 = sbr.rel (%p683_p13) target bundleno = 327 (0x147), region = 32  ;;  %s720_s10 = sand.u32 (!%p683_p13), 1, %s587_s13  }
  0x27   : > { %s380_s11 = sshll.u32 (!%p683_p13), %s720_s10, 4  ;;  %s174_s19 = scalar_lea.sflag (!%p683_p13), [#allocation3], %s720_s10 }
  0x28   : > { %s177_s28 = scalar_lea.vmem (!%p683_p13), [#allocation2], %s380_s11 }
  0x2b   : > { %570 = dma.done.wait (%p668_p6), %s174_s19, 256  }
  0x2c   : > { %572 = vsyncadd (%p668_p6), %s174_s19, 4294967040 }
  0x2d   : > { %574 = dma.done.wait (%p41_p4), [#allocation6], 16  }
  0x2e   : > { %576 = vsyncadd (%p41_p4), [#allocation6], 4294967280  ;;  %v208_v0 = vld [vmem:[%s177_s28] sm:$0xff]  ;;  %v209_v1 = vld [vmem:[%s177_s28 + $0x8] sm:$0xff]  ;;  %v600_v2 = vmov 128.0   ;;  %s382_s23 = sshll.u32 %s720_s10, 3 }
  0x2f   : > { %210 = vadd.xlane.f32.xlu0 %v208_v0  ;;  %459 = vrcp.f32 %v600_v2  ;;  %v457_v35 = vld [vmem:[#allocation5] ss:$0 sm:$0xff]  ;;  %s389_s26 = sshll.u32 %s644_s16, 3  ;;  %s205_s29 = scalar_lea.vmem [#allocation7], %s382_s23 }
  0x30   : > { %s285_s20 = scalar_lea.hbm %s772_s3, %s389_s26  ;;  %v458_v39 = vld [vmem:[%s771_s2] ss:$0 sm:$0xff]  ;;  %s286_s30 = sshll.u32 %s205_s29, 4  ;;  %s287_s30 = int_to_ptr.vmem [resolvable:$true] %s286_s30 }
  0x31   : > { %s288_s16 = sshll.u32 %s285_s20, 4  ;;  %s274_s4 = scalar_lea.sflag [#allocation4], %s720_s10  ;;  %s289_s16 = int_to_ptr.hbm [resolvable:$true] %s288_s16 }
  0x32   : > { %s539_s9 = sshra.s32 %s289_s16, 4  ;;  %s545_s11 = scalar_lea.hbm %s772_s3, 16  ;;  %s540_s9 = int_to_ptr.hbm [resolvable:$true] %s539_s9 }
  0x33   : > { %s541_s8 = scalar_lea.hbm %s540_s9, 8  ;;  %p546_p0 = scmp.lt.s32.totalorder %s540_s9, %s772_s3 }
  0x34   : > { %p542_p4 = scmp.ne.s32.totalorder %s540_s9, %s541_s8  ;;  %p547_p7 = scmp.lt.s32.totalorder %s545_s11, %s541_s8 }
  0x35   : > { %v460_v3 = vpop.eup %459 }
  0x36   : > { %v215_v4 = vmul.f32 128.0, %v460_v3  ;;  %vm219_vm0 = vweird.f32 %v460_v3  ;;  %p543_p6 = pnand %p542_p4, %p675_p11  ;;  %p548_p5 = por %p547_p7, %p546_p0 }
  0x37   : > { %212 = vadd.xlane.f32.xlu0 %v209_v1 }
  0x38   : > { %v216_v5 = vsub.f32 1.0, %v215_v4  ;;  %p544_p13 = pneg %p543_p6 }
  0x3a   : > { %v217_v6 = vmul.f32 %v460_v3, %v216_v5  ;;  %p549_p8 = pnand %p548_p5, %p544_p13 }
  0x3c   : > { %v218_v7 = vadd.f32 %v460_v3, %v217_v6 }
  0x3e   : > { %v220_v8 = vsel %vm219_vm0, %v460_v3, %v218_v7 }
  0xa2   : > { %v211_v9 = vpop.xlane.xlu0 %210 }
  0xa3   : > { %v221_v10 = vmul.f32 %v220_v8, %v211_v9 }
  0xa5   : > { %v223_v11 = vsub.f32 %v208_v0, %v221_v10 }
  0xa7   : > { %v225_v12 = vmul.f32 %v223_v11, %v223_v11 }
  0xa9   : > { %227 = vadd.xlane.f32.xlu1 %v225_v12 }
  0xaa   : > { %v213_v13 = vpop.xlane.xlu0 %212 }
  0xab   : > { %v222_v14 = vmul.f32 %v220_v8, %v213_v13 }
  0xad   : > { %v224_v15 = vsub.f32 %v209_v1, %v222_v14 }
  0xaf   : > { %v226_v16 = vmul.f32 %v224_v15, %v224_v15 }
  0xb1   : > { %229 = vadd.xlane.f32.xlu1 %v226_v16 }
 0x11c   : > { %v228_v17 = vpop.xlane.xlu1 %227 }
 0x11d   : > { %v231_v18 = vmul.f32 %v228_v17, %v220_v8 }
 0x11f   : > { %v233_v19 = vadd.f32 1e-12, %v231_v18 }
 0x121   : > { %461 = vrsqrt.f32 %v233_v19  ;;  %vm241_vm2 = vweird.f32 %v233_v19 }
 0x124   : > { %v230_v20 = vpop.xlane.xlu1 %229 }
 0x125   : > { %v232_v21 = vmul.f32 %v230_v20, %v220_v8 }
 0x127   : > { %v462_v22 = vpop.eup %461  ;;  %v234_v23 = vadd.f32 1e-12, %v232_v21 }
 0x128   : > { %v236_v24 = vmul.f32 %v462_v22, %v233_v19  ;;  %vm242_vm1 = vweird.f32 %v462_v22 }
 0x129   : > { %463 = vrsqrt.f32 %v234_v23  ;;  %vm243_vm3 = vmor %vm241_vm2, %vm242_vm1  ;;  %vm251_vm5 = vweird.f32 %v234_v23 }
 0x12a   : > { %v237_v25 = vmul.f32 %v462_v22, %v236_v24 }
 0x12c   : > { %v238_v26 = vmul.f32 0.5, %v237_v25 }
 0x12e   : > { %v239_v27 = vsub.f32 1.5, %v238_v26 }
 0x12f   : > { %v464_v28 = vpop.eup %463 }
 0x130   : > { %v240_v29 = vmul.f32 %v462_v22, %v239_v27  ;;  %v246_v30 = vmul.f32 %v464_v28, %v234_v23  ;;  %vm252_vm4 = vweird.f32 %v464_v28 }
 0x131   : > { %vm253_vm6 = vmor %vm251_vm5, %vm252_vm4 }
 0x132   : > { %v247_v31 = vmul.f32 %v464_v28, %v246_v30  ;;  %v244_v32 = vsel %vm243_vm3, %v462_v22, %v240_v29 }
 0x133   : > { %v255_v36 = vmul.f32 %v244_v32, %v223_v11 }
 0x134   : > { %v248_v33 = vmul.f32 0.5, %v247_v31 }
 0x135   : > { %v261_v40 = vmul.f32 %v457_v35, %v255_v36 }
 0x136   : > { %v249_v34 = vsub.f32 1.5, %v248_v33 }
 0x137   : > { %v267_v43 = vadd.f32 %v458_v39, %v261_v40 }
 0x138   : > { %v250_v37 = vmul.f32 %v464_v28, %v249_v34 }
 0x13a   : > { %v254_v38 = vsel %vm253_vm6, %v464_v28, %v250_v37 }
 0x13b   : > { %v256_v41 = vmul.f32 %v254_v38, %v224_v15 }
 0x13d   : > { %v262_v42 = vmul.f32 %v457_v35, %v256_v41 }
 0x13f   : > { %v268_v44 = vadd.f32 %v458_v39, %v262_v42 }
 0x141   : > { %v393_v45 = vpack.c.bf16 %v268_v44, %v267_v43 }
 0x143   : > { %394 = vst [vmem:[%s205_s29] sm:$0xff] %v393_v45  }
 0x144   : > { %552 = shalt.err (!%p549_p8)
}
 0x145   : > { %s601_s10 = smov 64   ;;  %s602_s23 = smov 4  }
 0x146   : > { %401 = dma.vmem_to_hbm [thread:$0]  (%p675_p11), %s287_s30, 128, %s289_s16, %s274_s4, %s601_s10, %s601_s10, %s602_s23  }
 0x147 PF: > { %s303_s26 = sand.u32 1, %s583_s12   ;;  %p779_p9 = scmp.ge.s32.totalorder %s595_s15, 2 }
 0x148   : > { %s304_s6 = scalar_lea.sflag [#allocation4], %s303_s26 }
 0x149   : > { %p412_p10 = pnand %p779_p9, %p679_p12 }
 0x14b   : > { %p413_p1 = pneg %p412_p10 }
 0x14d   : > { %578 = dma.done.wait (%p413_p1), %s304_s6, 128  }
 0x14e   : > { %580 = vsyncadd (%p413_p1), %s304_s6, 4294967168  ;;  %p17_p2 = scmp.ge.s32.totalorder %s648_s18, 4   ;;  %s780_s12 = smov %s587_s13 }
 0x14f   : > { %s781_s13 = smov %s591_s14  ;;  %s782_s14 = smov %s660_s21 }
 0x150   : > { %s783_s15 = smov %s648_s18  ;;  %19 = sbr.rel (!%p17_p2) target bundleno = 6 (0x6), region = 81 }
 0x155   :  { %310 = vsyncpa [#allocation3], 1 }
 0x156   :  { %312 = vsyncpa [#allocation3 + $0x1], 1 }
 0x157   :  { %313 = vsyncpa [#allocation6], 1 }
 0x158   :  { %314 = vsyncpa [#allocation4], 1 }
 0x159   :  { %316 = vsyncpa [#allocation4 + $0x1], 1 }

</bundles_post_ra>
